<compile_context>
chip_gen: v6e
topology: v6e:2x2x1
jax: 0.10.0
libtpu: 0.0.40
codegen_flags: <defaults>
</compile_context>

<pallas_src>
import functools
import math

import jax
import jax.numpy as jnp
from jax.experimental import pallas as pl
from jax.experimental.pallas import tpu as pltpu


# ---------------------------------------------------------------------------
# Pallas kernel: fused style-linear + per-channel affine modulation
# ---------------------------------------------------------------------------
def _style_mod_kernel(latent_ref, w_ref, b_ref, x_ref, o_ref,
                      scale_ref, shift_ref, *, channels, w_mul, b_mul):
    # latent_ref: (1, 1, L)    w_ref: (2C, L)    b_ref: (2C, 1)
    # x_ref/o_ref: (1, C, T)   scale_ref/shift_ref: (C, 1) f32 VMEM scratch

    @pl.when(pl.program_id(1) == 0)
    def _():
        lat = latent_ref[0]                                        # (1, L)
        # style[c] = sum_l w[c, l] * latent[l]  -> column vector (2C, 1).
        # VPU multiply + lane reduce (once per image; negligible work, and the
        # column orientation is exactly what the broadcast below needs).
        style = jnp.sum(w_ref[...] * lat, axis=1, keepdims=True)   # (2C, 1)
        style = style * w_mul + b_ref[...] * b_mul
        scale_ref[...] = style[:channels, :] + 1.0                 # (C, 1)
        shift_ref[...] = style[channels:, :]                       # (C, 1)

    # (1, C, T) * (C, 1) + (C, 1): per-channel scalars broadcast along the
    # lane-dense spatial axis.
    o_ref[...] = (x_ref[...] * scale_ref[...] + shift_ref[...]).astype(o_ref.dtype)


def _pick_hw_tile(hw, c, itemsize, budget_bytes=2 << 20):
    """Largest lane-dense (multiple-of-128) divisor of hw under a VMEM budget."""
    cap = max(128, budget_bytes // max(1, c * itemsize))
    if hw <= cap:
        return hw
    t = cap - cap % 128
    while t >= 128:
        if hw % t == 0:
            return t
        t -= 128
    t = cap - cap % 8
    while t >= 8:
        if hw % t == 0:
            return t
        t -= 8
    # No reasonable divisor (non-power-of-two spatial size): fall back to the
    # full spatial extent and rely on the vmem limit.
    return hw


def style_mod_pallas(x, latent, weight, bias, w_mul, b_mul):
    """x: (N, C, *spatial); latent: (N, L); weight: (2C, L); bias: (2C,)."""
    N, C = x.shape[0], x.shape[1]
    spatial = x.shape[2:]
    HW = int(math.prod(spatial)) if spatial else 1
    L = latent.shape[-1]
    assert weight.shape == (2 * C, L)

    x_flat = x.reshape(N, C, HW)          # free reshape (contiguous minor dims)
    lat3 = latent.reshape(N, 1, L)        # tiny
    b_col = bias.reshape(2 * C, 1)        # tiny

    T = _pick_hw_tile(HW, C, x.dtype.itemsize)
    n_t = HW // T if HW % T == 0 else pl.cdiv(HW, T)

    # Explicit scoped-VMEM budget: double-buffered in/out tiles + (small,
    # constant-index) weight/bias/latent buffers + style scratch, with headroom.
    x_tile_bytes = C * T * x.dtype.itemsize
    w_bytes = weight.size * weight.dtype.itemsize
    misc_bytes = (2 * C + L + 4 * C) * 4
    need = 2 * (2 * x_tile_bytes) + 2 * w_bytes + misc_bytes
    vmem_limit = int(min(max(2 * need, 8 << 20), 48 << 20))

    kernel = functools.partial(_style_mod_kernel, channels=C,
                               w_mul=float(w_mul), b_mul=float(b_mul))

    out = pl.pallas_call(
        kernel,
        out_shape=jax.ShapeDtypeStruct((N, C, HW), x.dtype),
        grid_spec=pltpu.PrefetchScalarGridSpec(
            num_scalar_prefetch=0,
            grid=(N, n_t),
            in_specs=[
                pl.BlockSpec((1, 1, L), lambda n, t: (n, 0, 0)),       # latent
                # Weight/bias have constant index_maps, so they are DMA'd once
                # and stay resident (they are tiny relative to the x tiles).
                pl.BlockSpec((2 * C, L), lambda n, t: (0, 0)),         # weight
                pl.BlockSpec((2 * C, 1), lambda n, t: (0, 0)),         # bias
                pl.BlockSpec((1, C, T), lambda n, t: (n, 0, t)),       # x tile
            ],
            out_specs=pl.BlockSpec((1, C, T), lambda n, t: (n, 0, t)),
            scratch_shapes=[pltpu.VMEM((C, 1), jnp.float32),           # scale
                            pltpu.VMEM((C, 1), jnp.float32)],          # shift
        ),
        compiler_params=pltpu.CompilerParams(
            dimension_semantics=("parallel", "arbitrary"),
            vmem_limit_bytes=vmem_limit),
    )(lat3, weight, b_col, x_flat)

    return out.reshape(x.shape)


# ---------------------------------------------------------------------------
# StyleMod module (parameter setup in plain JAX, forward fused in Pallas)
# ---------------------------------------------------------------------------
class StyleModPallas:
    def __init__(self, latent_size, channels, use_wscale, *, key,
                 gain=1.0, lrmul=1.0):
        # MyLinear(latent_size, channels * 2, gain=1.0, use_wscale=use_wscale)
        self.channels = channels
        he_std = gain * latent_size ** (-0.5)
        if use_wscale:
            init_std = 1.0 / lrmul
            self.w_mul = he_std * lrmul
        else:
            init_std = he_std / lrmul
            self.w_mul = lrmul
        # weight ~ randn(2C, L) * init_std   (PyTorch F.linear layout)
        self.weight = jax.random.normal(
            key, (2 * channels, latent_size), jnp.float32) * init_std
        self.bias = jnp.zeros((2 * channels,), jnp.float32)
        self.b_mul = lrmul

    def __call__(self, x, latent):
        # x: (N, C, *spatial);  latent: (N, latent_size)
        return style_mod_pallas(x, latent, self.weight, self.bias,
                                self.w_mul, self.b_mul)


# ---------------------------------------------------------------------------
# Reference (pure JAX) to validate the kernel
# ---------------------------------------------------------------------------
def _reference_forward(mod, x, latent):
    w = mod.weight * mod.w_mul                      # (2C, L)
    b = mod.bias * mod.b_mul                        # (2C,)
    style = latent @ w.T + b                        # (N, 2C)
    C = mod.channels
    shape = (-1, 2, C) + (1,) * (x.ndim - 2)
    style = style.reshape(shape)
    return x * (style[:, 0] + 1.0) + style[:, 1]


if __name__ == "__main__":
    key = jax.random.PRNGKey(0)
    k_w, k_x, k_lat = jax.random.split(key, 3)

    N, C, H, W, L = 2, 4, 16, 16, 32
    mod = StyleModPallas(latent_size=L, channels=C, use_wscale=True, key=k_w)

    x = jax.random.normal(k_x, (N, C, H, W), jnp.float32)
    latent = jax.random.normal(k_lat, (N, L), jnp.float32)

    y = mod(x, latent)
    jax.block_until_ready(y)

    y_ref = _reference_forward(mod, x, latent)
    assert y.shape == (N, C, H, W)
    assert jnp.allclose(y, y_ref, atol=1e-4, rtol=1e-4)

    print("KERNEL_OK")
</pallas_src>

<mosaic_0001>
module attributes {stable_mosaic.version = 11 : i64} {
  func.func @_style_mod_kernel(%arg0: i32, %arg1: i32, %arg2: memref<1x1x32xf32, #tpu.memory_space<vmem>>, %arg3: memref<8x32xf32, #tpu.memory_space<vmem>>, %arg4: memref<8x1xf32, #tpu.memory_space<vmem>>, %arg5: memref<1x4x256xf32, #tpu.memory_space<vmem>>, %arg6: memref<1x4x256xf32, #tpu.memory_space<vmem>>, %arg7: memref<4x1xf32, #tpu.memory_space<vmem>>, %arg8: memref<4x1xf32, #tpu.memory_space<vmem>>) attributes {dimension_semantics = [#tpu.dimension_semantics<parallel>, #tpu.dimension_semantics<arbitrary>], iteration_bounds = array<i64: 2, 1>, scalar_prefetch = 0 : i64, scratch_operands = 2 : i64, tpu.core_type = #tpu.core_type<tc>, window_params = [{transform_indices = @transform_0, window_bounds = array<i64: 1, 1, 32>}, {pipeline_mode = #tpu.pipeline_mode<synchronous>, transform_indices = @transform_1, window_bounds = array<i64: 8, 32>}, {pipeline_mode = #tpu.pipeline_mode<synchronous>, transform_indices = @transform_2, window_bounds = array<i64: 8, 1>}, {transform_indices = @transform_3, window_bounds = array<i64: 1, 4, 256>}, {transform_indices = @transform_4, window_bounds = array<i64: 1, 4, 256>}]} {
    %c0_i32 = arith.constant 0 : i32
    %0 = arith.cmpi eq, %arg1, %c0_i32 : i32
    %1 = arith.extui %0 : i1 to i32
    %c0_i32_0 = arith.constant 0 : i32
    %2 = arith.cmpi ne, %1, %c0_i32_0 : i32
    scf.if %2 {
      %c0_10 = arith.constant 0 : index
      %c0_11 = arith.constant 0 : index
      %c0_12 = arith.constant 0 : index
      %13 = vector.load %arg2[%c0_10, %c0_11, %c0_12] : memref<1x1x32xf32, #tpu.memory_space<vmem>>, vector<1x1x32xf32>
      %14 = vector.shape_cast %13 : vector<1x1x32xf32> to vector<1x32xf32>
      %c0_13 = arith.constant 0 : index
      %c0_14 = arith.constant 0 : index
      %15 = vector.load %arg3[%c0_13, %c0_14] : memref<8x32xf32, #tpu.memory_space<vmem>>, vector<8x32xf32>
      %16 = vector.broadcast %14 : vector<1x32xf32> to vector<8x32xf32>
      %17 = arith.mulf %15, %16 : vector<8x32xf32>
      %cst = arith.constant dense<0.000000e+00> : vector<8xf32>
      %18 = vector.multi_reduction <add>, %17, %cst [1] : vector<8x32xf32> to vector<8xf32>
      %19 = vector.shape_cast %18 : vector<8xf32> to vector<8x1xf32>
      %cst_15 = arith.constant 0.176776692 : f32
      %20 = vector.broadcast %cst_15 : f32 to vector<8x1xf32>
      %21 = arith.mulf %19, %20 : vector<8x1xf32>
      %c0_16 = arith.constant 0 : index
      %c0_17 = arith.constant 0 : index
      %22 = vector.load %arg4[%c0_16, %c0_17] : memref<8x1xf32, #tpu.memory_space<vmem>>, vector<8x1xf32>
      %cst_18 = arith.constant 1.000000e+00 : f32
      %23 = vector.broadcast %cst_18 : f32 to vector<8x1xf32>
      %24 = arith.mulf %22, %23 : vector<8x1xf32>
      %25 = arith.addf %21, %24 : vector<8x1xf32>
      %26 = vector.extract_strided_slice %25 {offsets = [0, 0], sizes = [4, 1], strides = [1, 1]} : vector<8x1xf32> to vector<4x1xf32>
      %cst_19 = arith.constant 1.000000e+00 : f32
      %27 = vector.broadcast %cst_19 : f32 to vector<4x1xf32>
      %28 = arith.addf %26, %27 : vector<4x1xf32>
      %c0_20 = arith.constant 0 : index
      %c0_21 = arith.constant 0 : index
      %29 = vector.load %arg7[%c0_20, %c0_21] : memref<4x1xf32, #tpu.memory_space<vmem>>, vector<4x1xf32>
      tpu.vector_store %arg7[%c0_20, %c0_21], %28 {strides = array<i32>} : memref<4x1xf32, #tpu.memory_space<vmem>>, vector<4x1xf32>,
      %30 = vector.extract_strided_slice %25 {offsets = [4, 0], sizes = [4, 1], strides = [1, 1]} : vector<8x1xf32> to vector<4x1xf32>
      %c0_22 = arith.constant 0 : index
      %c0_23 = arith.constant 0 : index
      %31 = vector.load %arg8[%c0_22, %c0_23] : memref<4x1xf32, #tpu.memory_space<vmem>>, vector<4x1xf32>
      tpu.vector_store %arg8[%c0_22, %c0_23], %30 {strides = array<i32>} : memref<4x1xf32, #tpu.memory_space<vmem>>, vector<4x1xf32>,
    } else {
    }
    %c0 = arith.constant 0 : index
    %c0_1 = arith.constant 0 : index
    %c0_2 = arith.constant 0 : index
    %3 = vector.load %arg5[%c0, %c0_1, %c0_2] : memref<1x4x256xf32, #tpu.memory_space<vmem>>, vector<1x4x256xf32>
    %c0_3 = arith.constant 0 : index
    %c0_4 = arith.constant 0 : index
    %4 = vector.load %arg7[%c0_3, %c0_4] : memref<4x1xf32, #tpu.memory_space<vmem>>, vector<4x1xf32>
    %5 = vector.shape_cast %4 : vector<4x1xf32> to vector<1x4x1xf32>
    %6 = vector.broadcast %5 : vector<1x4x1xf32> to vector<1x4x256xf32>
    %7 = arith.mulf %3, %6 : vector<1x4x256xf32>
    %c0_5 = arith.constant 0 : index
    %c0_6 = arith.constant 0 : index
    %8 = vector.load %arg8[%c0_5, %c0_6] : memref<4x1xf32, #tpu.memory_space<vmem>>, vector<4x1xf32>
    %9 = vector.shape_cast %8 : vector<4x1xf32> to vector<1x4x1xf32>
    %10 = vector.broadcast %9 : vector<1x4x1xf32> to vector<1x4x256xf32>
    %11 = arith.addf %7, %10 : vector<1x4x256xf32>
    %c0_7 = arith.constant 0 : index
    %c0_8 = arith.constant 0 : index
    %c0_9 = arith.constant 0 : index
    %12 = vector.load %arg6[%c0_7, %c0_8, %c0_9] : memref<1x4x256xf32, #tpu.memory_space<vmem>>, vector<1x4x256xf32>
    tpu.vector_store %arg6[%c0_7, %c0_8, %c0_9], %11 {strides = array<i32>} : memref<1x4x256xf32, #tpu.memory_space<vmem>>, vector<1x4x256xf32>,
    return
  }
  func.func @transform_0(%arg0: i32, %arg1: i32) -> (i32, i32, i32) {
    %c0_i32 = arith.constant 0 : i32
    %c0_i32_0 = arith.constant 0 : i32
    %c0_i32_1 = arith.constant 0 : i32
    return %arg0, %c0_i32, %c0_i32_0 : i32, i32, i32
  }
  func.func @transform_1(%arg0: i32, %arg1: i32) -> (i32, i32) {
    %c0_i32 = arith.constant 0 : i32
    %c0_i32_0 = arith.constant 0 : i32
    %c0_i32_1 = arith.constant 0 : i32
    return %c0_i32, %c0_i32_0 : i32, i32
  }
  func.func @transform_2(%arg0: i32, %arg1: i32) -> (i32, i32) {
    %c0_i32 = arith.constant 0 : i32
    %c0_i32_0 = arith.constant 0 : i32
    %c0_i32_1 = arith.constant 0 : i32
    return %c0_i32, %c0_i32_0 : i32, i32
  }
  func.func @transform_3(%arg0: i32, %arg1: i32) -> (i32, i32, i32) {
    %c0_i32 = arith.constant 0 : i32
    %c0_i32_0 = arith.constant 0 : i32
    return %arg0, %c0_i32, %arg1 : i32, i32, i32
  }
  func.func @transform_4(%arg0: i32, %arg1: i32) -> (i32, i32, i32) {
    %c0_i32 = arith.constant 0 : i32
    %c0_i32_0 = arith.constant 0 : i32
    return %arg0, %c0_i32, %arg1 : i32, i32, i32
  }
}

</mosaic_0001>

<bundles_post_ra>
// kernel: tpu_custom_call.1
= control target key start
LH: loop header
LB: loop body
LE: loop exit
PB: predicated region body
PF: predicated region fallthrough
CT: control target
= control target key end

     0   :  { %9 = vsyncpa [#allocation5], 0  ;;  %s788_s0 = inlined_call_operand.vmem [shape: f32[2,1,32], index: 0, kind: input, shape index: {}]   ;;  %s789_s1 = inlined_call_operand.vmem [shape: f32[8,32], index: 1, kind: input, shape index: {}]   ;;  %s790_s2 = inlined_call_operand.vmem [shape: f32[8,1], index: 2, kind: input, shape index: {}]   ;;  %s791_s3 = inlined_call_operand.hbm [shape: f32[2,4,256], index: 3, kind: input, shape index: {}]   ;;  %s792_s4 = inlined_call_operand.hbm [shape: f32[2,4,256], index: 4, kind: output, shape index: {}]  }
   0x1   :  { %11 = vsyncpa [#allocation5 + $0x1], 0 }
   0x2   :  { %12 = vsyncpa [#allocation6], 0 }
   0x3   :  { %14 = vsyncpa [#allocation6 + $0x1], 0  ;;  %s636_s15 = smov 0   ;;  %s638_s16 = smov 0  }
   0x4   :  { %s640_s17 = smov 0   ;;  %s642_s18 = smov 0  }
   0x5   :  { %s644_s19 = smov 0   ;;  %s646_s20 = smov 0  }
   0x6 LB: > { %s413_s21 = sadd.s32 4294967295, %s605_s20   ;;  %s414_s22 = sadd.s32 4294967294, %s605_s20   ;;  %s605_s20 = sphi %s646_s20, %s20_s20   ;;  %s601_s19 = sphi %s644_s19, %s804_s19   ;;  %s597_s18 = sphi %s642_s18, %s803_s18   ;;  %s593_s17 = sphi %s640_s17, %s802_s17   ;;  %s589_s16 = sphi %s638_s16, %s801_s16   ;;  %s585_s15 = sphi %s636_s15, %s800_s15  }
   0x7   : > { %s32_s23 = sadd.s32 1, %s601_s19  ;;  %s109_s24 = sadd.s32 1, %s593_s17 }
   0x8   : > { %p34_p0 = scmp.ge.s32.totalorder %s32_s23, 2  ;;  %p116_p1 = scmp.ne.s32.totalorder %s593_s17, %s589_s16 }
   0x9   : > { %p117_p2 = scmp.eq.s32.totalorder %s605_s20, 0  ;;  %p122_p3 = scmp.ne.s32.totalorder %s589_s16, %s585_s15 }
   0xa   : > { %s806_s23 = smov (%p34_p0, %s32_s23), 0  ;;  %p123_p5 = scmp.eq.s32.totalorder %s413_s21, 0 }
   0xb   : > { %p677_p4 = por %p117_p2, %p116_p1  ;;  %s104_s26 = ssub.s32 %s601_s19, %s806_s23 }
   0xc   : > { %p148_p6 = scmp.eq.s32.totalorder %s413_s21, 1  ;;  %p107_p7 = scmp.eq.s32.totalorder %s104_s26, 0 }
   0xd   : > { %p683_p8 = por %p123_p5, %p122_p3  ;;  %p154_p10 = scmp.eq.s32.totalorder %s414_s22, 1 }
   0xe   : > { %p687_p9 = por %p148_p6, %p116_p1  ;;  %p443_p13 = scmp.lt.s32.totalorder %s605_s20, 2 }
   0xf   : > { %s692_s29 = scalar_select %p107_p7, %s593_s17, %s109_s24  }
  0x10   : > { %p694_p11 = por %p154_p10, %p122_p3  ;;  %s186_s5 = sand.u32 1, %s593_s17  }
  0x11   : > { %s417_s6 = sshll.u32 %s186_s5, 3  ;;  %s429_s7 = sshll.u32 %s601_s19, 7 }
  0x12   : > { %s796_s30 = scalar_select %p694_p11, 1, 0 }
  0x13   : > { %s198_s10 = scalar_lea.hbm %s791_s3, %s429_s7  ;;  %s190_s11 = scalar_lea.vmem [#allocation4], %s417_s6 }
  0x14   : > { %s200_s12 = sshll.u32 %s190_s11, 4  ;;  %p707_p0 = pnand %p443_p13, %p677_p4  ;;  %s201_s12 = int_to_ptr.vmem [resolvable:$true] %s200_s12 }
  0x15   : > { %p420_p1 = scmp.ge.s32.totalorder %s605_s20, 1  ;;  %p205_p2 = scmp.lt.s32.totalorder %s605_s20, 3 }
  0x16   : > { %s187_s14 = scalar_lea.sflag [#allocation5], %s186_s5  ;;  %p499_p3 = pneg %p707_p0 }
  0x17   : > { %s510_s21 = scalar_lea.vmem %s201_s12, 128  ;;  %s607_s22 = smov [#allocation4]  }
  0x18   : > { %p511_p5 = scmp.ne.s32.totalorder %s201_s12, %s510_s21  ;;  %s515_s24 = sshll.u32 %s607_s22, 4  ;;  %s516_s24 = int_to_ptr.vmem [resolvable:$false] %s515_s24 }
  0x19   : > { %s517_s26 = scalar_lea.vmem %s516_s24, 256  ;;  %p518_p10 = scmp.lt.s32.totalorder %s201_s12, %s516_s24 }
  0x1a   : > { %p513_p6 = pnand %p511_p5, %p499_p3  ;;  %p519_p12 = scmp.lt.s32.totalorder %s517_s26, %s510_s21 }
  0x1c   : > { %p514_p7 = pneg %p513_p6  ;;  %p520_p4 = por %p519_p12, %p518_p10 }
  0x1e   : > { %p521_p13 = pnand %p520_p4, %p514_p7 }
  0x20   : > { %524 = shalt.err (!%p521_p13)
}
  0x21   : > { %438 = dma.hbm_to_vmem [thread:$0]  (!%p707_p0), %s198_s10, 128, %s201_s12, %s187_s14  }
  0x22   : > { %p206_p11 = pnand %p420_p1, %p205_p2 }
  0x23   : > { %s722_s25 = sand.u32 (!%p206_p11), 1, %s589_s16  }
  0x24   : > { %209 = sbr.rel (%p206_p11) target bundleno = 346 (0x15a), region = 36  ;;  %s421_s5 = sshll.u32 (!%p206_p11), %s722_s25, 3 }
  0x25   : > { %s212_s6 = scalar_lea.sflag (!%p206_p11), [#allocation5], %s722_s25  ;;  %s728_s7 = scalar_lea.vmem (!%p206_p11), [#allocation4], %s421_s5 }
  0x29   : > { %576 = dma.done.wait (%p683_p8), %s212_s6, 128  }
  0x2a   : > { %578 = vsyncadd (%p683_p8), %s212_s6, 4294967168  ;;  %p243_p11 = scmp.lt.s32.totalorder %s597_s18, 1  ;;  %v253_v1 = vld [vmem:[%s789_s1] sm:$0xff]  ;;  %vm261_vm0 = vcmask 261120   ;;  %v608_v4 = vmov 0   ;;  %vm271_vm1 = vcmask 7172   ;;  %v282_v14 = vlaneseq }
  0x2b   : > { %496 = vset.pattern.permute.xlu1 %v608_v4  ;;  %495 = vset.pattern.permute.xlu0 %v608_v4  ;;  %v266_v5 = vld [vmem:[%s790_s2] sm:$0xff]  ;;  %vm269_vm2 = vcmask 3072   ;;  %v609_v12 = vmov 839922192   ;;  %v273_v19 = vld [vmem:[%s728_s7] sm:$0xff]  ;;  %s430_s21 = sshll.u32 %s597_s18, 7 }
  0x2c   : > { %s244_s8 = scalar_select %p243_p11, %s597_s18, 1  ;;  %v280_v13 = vunpack.c.l.s4 %v609_v12  ;;  %v283_v16 = vshrl.u32 %v282_v14, 7 }
  0x2d   : > { %s242_s22 = scalar_lea.vmem [#allocation7], %s421_s5  ;;  %s304_s9 = scalar_lea.sflag [#allocation6], %s722_s25 }
  0x2e   : > { %s245_s11 = scalar_lea.vmem %s788_s0, %s244_s8  ;;  %v281_v15 = vunpack.c.0.s8 %v280_v13  ;;  %s320_s24 = sshll.u32 %s242_s22, 4  ;;  %s321_s24 = int_to_ptr.vmem [resolvable:$true] %s320_s24 }
  0x2f   : > { %v423_v0 = vld [vmem:[%s245_s11] ss:$0 sm:$0xff]  ;;  %s318_s8 = scalar_lea.hbm %s792_s4, %s430_s21  ;;  %s525_s10 = scalar_lea.vmem %s321_s24, 128 }
  0x30   : > { %v260_v2 = vmul.f32 %v423_v0, %v253_v1  ;;  %v284_v17 = vsub.s32 %v281_v15, %v283_v16  ;;  %p526_p8 = scmp.ne.s32.totalorder %s321_s24, %s525_s10  ;;  %s610_s7 = smov [#allocation7]  }
  0x31   : > { %s529_s18 = sshll.u32 %s610_s7, 4  ;;  %s530_s18 = int_to_ptr.vmem [resolvable:$false] %s529_s18 }
  0x32   : > { %v262_v3 = vsel %vm261_vm0, %v260_v2, 0.0  ;;  %p527_p12 = pnand %p526_p8, %p687_p9  ;;  %s531_s5 = scalar_lea.vmem %s530_s18, 256 }
  0x33   : > { %263 = vadd.xlane.f32.xlu0 %v262_v3  ;;  %p532_p1 = scmp.lt.s32.totalorder %s321_s24, %s530_s18  ;;  %p533_p2 = scmp.lt.s32.totalorder %s531_s5, %s525_s10 }
  0x34   : > { %p528_p0 = pneg %p527_p12 }
  0x35   : > { %p534_p3 = por %p533_p2, %p532_p1 }
  0x37   : > { %p535_p5 = pnand %p534_p3, %p528_p0 }
  0xbc   : > { %v264_v6 = vpop.xlane.xlu0 %263 }
  0xbd   : > { %v265_v7 = vmul.f32 0.17677669, %v264_v6 }
  0xbf   : > { %v267_v8 = vadd.f32 %v266_v5, %v265_v7 }
  0xc1   : > { %v268_v9 = vadd.f32 1.0, %v267_v8  ;;  %272 = vst.msk [vmem:[#allocation3 - $0x4] sm:$0xf0] %vm271_vm1, %v267_v8 }
  0xc3   : > { %270 = vst.msk [vmem:[#allocation2] sm:$0xf] %vm269_vm2, %v268_v9 }
  0xc8   : > { %v288_v10 = vld [vmem:[#allocation3] sm:$0xf] }
  0xc9   : > { %291 = vperm.xlu1 %496, %v288_v10  }
  0xca   : > { %v274_v11 = vld [vmem:[#allocation2] sm:$0xf] }
  0xcb   : > { %277 = vperm.xlu0 %495, %v274_v11  }
 0x144   : > { %v292_v18 = vpop.permute.xlu1 %291 }
 0x145   : > { %v299_v22 = vrot.slane %v292_v18, %v284_v17 }
 0x146   : > { %v278_v20 = vpop.permute.xlu0 %277 }
 0x147   : > { %v285_v21 = vrot.slane %v278_v20, %v284_v17 }
 0x149   : > { %v287_v23 = vmul.f32 %v285_v21, %v273_v19 }
 0x14b   : > { %v301_v24 = vadd.f32 %v299_v22, %v287_v23 }
 0x14d   : > { %302 = vst [vmem:[%s242_s22] sm:$0xff] %v301_v24 }
 0x14e   : > { %538 = shalt.err (!%p535_p5)
}
 0x14f   : > { %s539_s11 = scalar_lea.hbm %s318_s8, 128  ;;  %s543_s13 = scalar_lea.hbm %s792_s4, 256 }
 0x150   : > { %p540_p6 = scmp.ne.s32.totalorder %s318_s8, %s539_s11  ;;  %p544_p4 = scmp.lt.s32.totalorder %s318_s8, %s792_s4 }
 0x151   : > { %p545_p13 = scmp.lt.s32.totalorder %s543_s13, %s539_s11 }
 0x152   : > { %p541_p7 = pnand %p540_p6, %p687_p9 }
 0x153   : > { %p546_p11 = por %p545_p13, %p544_p4 }
 0x154   : > { %p542_p10 = pneg %p541_p7 }
 0x156   : > { %p547_p8 = pnand %p546_p11, %p542_p10 }
 0x158   : > { %550 = shalt.err (!%p547_p8)
}
 0x159   : > { %433 = dma.vmem_to_hbm [thread:$0]  (%p687_p9), %s321_s24, 128, %s318_s8, %s304_s9  }
 0x15a PF: > { %s332_s21 = sand.u32 1, %s585_s15   ;;  %p798_p12 = scmp.ne.s32.totalorder %s796_s30, 0 }
 0x15b   : > { %p799_p0 = scmp.ge.s32.totalorder %s605_s20, 2  ;;  %s333_s22 = scalar_lea.sflag [#allocation6], %s332_s21 }
 0x15d   : > { %p440_p1 = pnand %p799_p0, %p798_p12 }
 0x15f   : > { %p441_p2 = pneg %p440_p1 }
 0x161   : > { %580 = dma.done.wait (%p441_p2), %s333_s22, 128  }
 0x162   : > { %582 = vsyncadd (%p441_p2), %s333_s22, 4294967168  ;;  %s20_s20 = sadd.s32 1, %s605_s20   ;;  %s800_s15 = smov %s589_s16 }
 0x163   : > { %p17_p3 = scmp.ge.s32.totalorder %s20_s20, 4   ;;  %s801_s16 = smov %s593_s17 }
 0x164   : > { %s802_s17 = smov %s692_s29  ;;  %s803_s18 = smov %s601_s19 }
 0x165   : > { %s804_s19 = smov %s806_s23  ;;  %19 = sbr.rel (!%p17_p3) target bundleno = 6 (0x6), region = 88 }
 0x16a   :  { %338 = vsyncpa [#allocation5], 1 }
 0x16b   :  { %340 = vsyncpa [#allocation5 + $0x1], 1 }
 0x16c   :  { %341 = vsyncpa [#allocation6], 1 }
 0x16d   :  { %343 = vsyncpa [#allocation6 + $0x1], 1 }

</bundles_post_ra>
